<compile_context>
chip_gen: v5e
topology: v5e:2x2
jax: 0.10.0
libtpu: 0.0.40
codegen_flags: <defaults>
</compile_context>

<pallas_src>
import functools

import jax
import jax.numpy as jnp
from jax.experimental import pallas as pl
from jax.experimental.pallas import tpu as pltpu


def _moe_loss_kernel(logits_ref, probs_ref, y_ref, out_ref, *, batch_size):
    """One batch tile.

    logits_ref: [E, TB, C] (any float dtype)   probs_ref: [TB, E]
    y_ref:      [TB, 1] int32                  out_ref:   [TB, 1] f32
    """
    num_experts, tb, c = logits_ref.shape

    y = y_ref[...]                                                  # [TB, 1] i32
    cls_iota = jax.lax.broadcasted_iota(jnp.int32, (tb, c), 1)      # [TB, C]
    label_mask = cls_iota == y                                      # [TB, C]

    # Mixture p(Y|X) accumulated expert-by-expert (E is small & static, so the
    # unrolled loop keeps only one [TB, C] expert tile of temporaries live).
    p_mix = jnp.zeros((tb, 1), jnp.float32)
    for e in range(num_experts):
        logits_e = logits_ref[e].astype(jnp.float32)                # [TB, C]
        m = jnp.max(logits_e, axis=-1, keepdims=True)               # [TB, 1]
        shifted = logits_e - m                                      # reused twice
        sumexp = jnp.sum(jnp.exp(shifted), axis=-1, keepdims=True)  # [TB, 1]
        picked = jnp.sum(jnp.where(label_mask, shifted, 0.0),
                         axis=-1, keepdims=True)                    # [TB, 1]
        # p(Y|E=e) = exp(picked_logit - logsumexp) = exp(picked) / sumexp
        gate_e = probs_ref[:, e:e + 1].astype(jnp.float32)          # [TB, 1]
        p_mix = p_mix + (jnp.exp(picked) / sumexp) * gate_e

    log_p = jnp.log(p_mix)                                          # [TB, 1]

    # Mask padded rows of a partial last batch tile.
    row = pl.program_id(0) * tb + jax.lax.broadcasted_iota(jnp.int32, (tb, 1), 0)
    out_ref[...] = jnp.where(row < batch_size, log_p, 0.0)


def moe_loss(experts_logits, experts_probs, y, *, tb=None,
             vmem_budget_bytes=20 << 20):
    """experts_logits: [E, B, C] float; experts_probs: [B, E] float; y: [B] int."""
    E, B, C = experts_logits.shape
    assert experts_probs.shape == (B, E)
    itemsize = jnp.dtype(experts_logits.dtype).itemsize

    # Pick the largest batch tile that keeps the (double-buffered) logits block
    # inside a conservative VMEM budget valid on v5e/v6e/v7x.
    if tb is None:
        bytes_per_row = E * C * itemsize + E * 4 + 4 + 4
        tb = max(8, (vmem_budget_bytes // max(bytes_per_row, 1)) // 8 * 8)
    tb = int(min(tb, B)) if B >= 8 else int(B)
    if tb != B:  # non-full tiles must satisfy the sublane (multiple-of-8) rule
        tb = max(8, (tb // 8) * 8)

    nt = pl.cdiv(B, tb)
    b_pad = nt * tb

    y2d = y.astype(jnp.int32).reshape(B, 1)
    probs = experts_probs.astype(jnp.float32)

    block_bytes = E * tb * C * itemsize + tb * E * 4 + tb * 4 + tb * 4
    vmem_limit = int(min(max(3 * block_bytes + (1 << 20), 32 << 20), 56 << 20))

    kernel = functools.partial(_moe_loss_kernel, batch_size=B)

    log_p = pl.pallas_call(
        kernel,
        out_shape=jax.ShapeDtypeStruct((b_pad, 1), jnp.float32),
        grid_spec=pltpu.PrefetchScalarGridSpec(
            num_scalar_prefetch=0,
            grid=(nt,),
            in_specs=[
                pl.BlockSpec((E, tb, C), lambda i: (0, i, 0)),   # logits tile
                pl.BlockSpec((tb, E), lambda i: (i, 0)),         # gate probs tile
                pl.BlockSpec((tb, 1), lambda i: (i, 0)),         # labels tile
            ],
            out_specs=pl.BlockSpec((tb, 1), lambda i: (i, 0)),
        ),
        compiler_params=pltpu.CompilerParams(
            dimension_semantics=("parallel",),
            vmem_limit_bytes=vmem_limit,
        ),
    )(experts_logits, probs, y2d)

    # Tiny final reduction (B scalars) done in the wrapper; padded rows are 0.
    return -jnp.sum(log_p) / B


def moe_loss_ref(experts_logits, experts_probs, y):
    """Pure-JAX reference mirroring the PyTorch forward."""
    log_losses = []
    for logits in experts_logits:                       # logits: [B, C]
        lse = jax.nn.logsumexp(logits.astype(jnp.float32), axis=-1)
        picked = jnp.take_along_axis(logits.astype(jnp.float32),
                                     y[:, None], axis=-1)[:, 0]
        log_losses.append((lse - picked)[:, None])
    log_losses = jnp.concatenate(log_losses, axis=1)    # [B, E]
    p_y_given_e = jnp.exp(-log_losses)
    p_y_given_x = jnp.sum(p_y_given_e * experts_probs.astype(jnp.float32), axis=1)
    return -jnp.mean(jnp.log(p_y_given_x))


if __name__ == "__main__":
    E, B, C = 4, 32, 32  # experts, batch, classes
    key = jax.random.PRNGKey(0)
    k_logits, k_gate, k_y = jax.random.split(key, 3)

    experts_logits = jax.random.normal(k_logits, (E, B, C), dtype=jnp.float32)
    gate_logits = jax.random.normal(k_gate, (B, E), dtype=jnp.float32)
    experts_probs = jax.nn.softmax(gate_logits, axis=-1)      # gate probs sum to 1
    y = jax.random.randint(k_y, (B,), 0, C, dtype=jnp.int32)  # class labels

    # tb=8 exercises a 4-step batch grid on the small test shape.
    loss = jax.block_until_ready(moe_loss(experts_logits, experts_probs, y, tb=8))
    loss_ref = jax.block_until_ready(moe_loss_ref(experts_logits, experts_probs, y))

    assert jnp.allclose(loss, loss_ref, rtol=1e-5, atol=1e-5), (loss, loss_ref)
    print("KERNEL_OK")
</pallas_src>

<mosaic_0001>
module attributes {stable_mosaic.version = 11 : i64} {
  func.func @_moe_loss_kernel(%arg0: i32, %arg1: memref<4x8x32xf32, #tpu.memory_space<vmem>>, %arg2: memref<8x4xf32, #tpu.memory_space<vmem>>, %arg3: memref<8x1xi32, #tpu.memory_space<vmem>>, %arg4: memref<8x1xf32, #tpu.memory_space<vmem>>) attributes {dimension_semantics = [#tpu.dimension_semantics<parallel>], iteration_bounds = array<i64: 4>, scalar_prefetch = 0 : i64, scratch_operands = 0 : i64, tpu.core_type = #tpu.core_type<tc>, window_params = [{transform_indices = @transform_0, window_bounds = array<i64: 4, 8, 32>}, {transform_indices = @transform_1, window_bounds = array<i64: 8, 4>}, {transform_indices = @transform_2, window_bounds = array<i64: 8, 1>}, {transform_indices = @transform_3, window_bounds = array<i64: 8, 1>}]} {
    %c0 = arith.constant 0 : index
    %c0_0 = arith.constant 0 : index
    %0 = vector.load %arg3[%c0, %c0_0] : memref<8x1xi32, #tpu.memory_space<vmem>>, vector<8x1xi32>
    %1 = tpu.iota {dimensions = array<i32: 1>} : vector<8x32xi32>
    %2 = vector.broadcast %0 : vector<8x1xi32> to vector<8x32xi32>
    %3 = arith.cmpi eq, %1, %2 : vector<8x32xi32>
    %cst = arith.constant 0.000000e+00 : f32
    %4 = vector.broadcast %cst : f32 to vector<8x1xf32>
    %c0_1 = arith.constant 0 : index
    %c0_2 = arith.constant 0 : index
    %c0_3 = arith.constant 0 : index
    %5 = vector.load %arg1[%c0_1, %c0_2, %c0_3] : memref<4x8x32xf32, #tpu.memory_space<vmem>>, vector<1x8x32xf32>
    %6 = vector.shape_cast %5 : vector<1x8x32xf32> to vector<8x32xf32>
    %cst_4 = arith.constant dense<0xFF800000> : vector<8xf32>
    %7 = vector.multi_reduction <maximumf>, %6, %cst_4 [1] : vector<8x32xf32> to vector<8xf32>
    %8 = vector.shape_cast %7 : vector<8xf32> to vector<8x1xf32>
    %9 = vector.broadcast %8 : vector<8x1xf32> to vector<8x32xf32>
    %10 = arith.subf %6, %9 : vector<8x32xf32>
    %11 = math.exp %10 : vector<8x32xf32>
    %cst_5 = arith.constant dense<0.000000e+00> : vector<8xf32>
    %12 = vector.multi_reduction <add>, %11, %cst_5 [1] : vector<8x32xf32> to vector<8xf32>
    %13 = vector.shape_cast %12 : vector<8xf32> to vector<8x1xf32>
    %cst_6 = arith.constant 0.000000e+00 : f32
    %14 = vector.broadcast %cst_6 : f32 to vector<8x32xf32>
    %15 = arith.select %3, %10, %14 : vector<8x32xi1>, vector<8x32xf32>
    %cst_7 = arith.constant dense<0.000000e+00> : vector<8xf32>
    %16 = vector.multi_reduction <add>, %15, %cst_7 [1] : vector<8x32xf32> to vector<8xf32>
    %17 = vector.shape_cast %16 : vector<8xf32> to vector<8x1xf32>
    %c0_8 = arith.constant 0 : index
    %c0_9 = arith.constant 0 : index
    %18 = vector.load %arg2[%c0_8, %c0_9] : memref<8x4xf32, #tpu.memory_space<vmem>>, vector<8x1xf32>
    %19 = math.exp %17 : vector<8x1xf32>
    %20 = arith.divf %19, %13 : vector<8x1xf32>
    %21 = arith.mulf %20, %18 : vector<8x1xf32>
    %22 = arith.addf %4, %21 : vector<8x1xf32>
    %c1 = arith.constant 1 : index
    %c0_10 = arith.constant 0 : index
    %c0_11 = arith.constant 0 : index
    %23 = vector.load %arg1[%c1, %c0_10, %c0_11] : memref<4x8x32xf32, #tpu.memory_space<vmem>>, vector<1x8x32xf32>
    %24 = vector.shape_cast %23 : vector<1x8x32xf32> to vector<8x32xf32>
    %cst_12 = arith.constant dense<0xFF800000> : vector<8xf32>
    %25 = vector.multi_reduction <maximumf>, %24, %cst_12 [1] : vector<8x32xf32> to vector<8xf32>
    %26 = vector.shape_cast %25 : vector<8xf32> to vector<8x1xf32>
    %27 = vector.broadcast %26 : vector<8x1xf32> to vector<8x32xf32>
    %28 = arith.subf %24, %27 : vector<8x32xf32>
    %29 = math.exp %28 : vector<8x32xf32>
    %cst_13 = arith.constant dense<0.000000e+00> : vector<8xf32>
    %30 = vector.multi_reduction <add>, %29, %cst_13 [1] : vector<8x32xf32> to vector<8xf32>
    %31 = vector.shape_cast %30 : vector<8xf32> to vector<8x1xf32>
    %cst_14 = arith.constant 0.000000e+00 : f32
    %32 = vector.broadcast %cst_14 : f32 to vector<8x32xf32>
    %33 = arith.select %3, %28, %32 : vector<8x32xi1>, vector<8x32xf32>
    %cst_15 = arith.constant dense<0.000000e+00> : vector<8xf32>
    %34 = vector.multi_reduction <add>, %33, %cst_15 [1] : vector<8x32xf32> to vector<8xf32>
    %35 = vector.shape_cast %34 : vector<8xf32> to vector<8x1xf32>
    %c0_16 = arith.constant 0 : index
    %c1_17 = arith.constant 1 : index
    %36 = vector.load %arg2[%c0_16, %c1_17] : memref<8x4xf32, #tpu.memory_space<vmem>>, vector<8x1xf32>
    %37 = math.exp %35 : vector<8x1xf32>
    %38 = arith.divf %37, %31 : vector<8x1xf32>
    %39 = arith.mulf %38, %36 : vector<8x1xf32>
    %40 = arith.addf %22, %39 : vector<8x1xf32>
    %c2 = arith.constant 2 : index
    %c0_18 = arith.constant 0 : index
    %c0_19 = arith.constant 0 : index
    %41 = vector.load %arg1[%c2, %c0_18, %c0_19] : memref<4x8x32xf32, #tpu.memory_space<vmem>>, vector<1x8x32xf32>
    %42 = vector.shape_cast %41 : vector<1x8x32xf32> to vector<8x32xf32>
    %cst_20 = arith.constant dense<0xFF800000> : vector<8xf32>
    %43 = vector.multi_reduction <maximumf>, %42, %cst_20 [1] : vector<8x32xf32> to vector<8xf32>
    %44 = vector.shape_cast %43 : vector<8xf32> to vector<8x1xf32>
    %45 = vector.broadcast %44 : vector<8x1xf32> to vector<8x32xf32>
    %46 = arith.subf %42, %45 : vector<8x32xf32>
    %47 = math.exp %46 : vector<8x32xf32>
    %cst_21 = arith.constant dense<0.000000e+00> : vector<8xf32>
    %48 = vector.multi_reduction <add>, %47, %cst_21 [1] : vector<8x32xf32> to vector<8xf32>
    %49 = vector.shape_cast %48 : vector<8xf32> to vector<8x1xf32>
    %cst_22 = arith.constant 0.000000e+00 : f32
    %50 = vector.broadcast %cst_22 : f32 to vector<8x32xf32>
    %51 = arith.select %3, %46, %50 : vector<8x32xi1>, vector<8x32xf32>
    %cst_23 = arith.constant dense<0.000000e+00> : vector<8xf32>
    %52 = vector.multi_reduction <add>, %51, %cst_23 [1] : vector<8x32xf32> to vector<8xf32>
    %53 = vector.shape_cast %52 : vector<8xf32> to vector<8x1xf32>
    %c0_24 = arith.constant 0 : index
    %c2_25 = arith.constant 2 : index
    %54 = vector.load %arg2[%c0_24, %c2_25] : memref<8x4xf32, #tpu.memory_space<vmem>>, vector<8x1xf32>
    %55 = math.exp %53 : vector<8x1xf32>
    %56 = arith.divf %55, %49 : vector<8x1xf32>
    %57 = arith.mulf %56, %54 : vector<8x1xf32>
    %58 = arith.addf %40, %57 : vector<8x1xf32>
    %c3 = arith.constant 3 : index
    %c0_26 = arith.constant 0 : index
    %c0_27 = arith.constant 0 : index
    %59 = vector.load %arg1[%c3, %c0_26, %c0_27] : memref<4x8x32xf32, #tpu.memory_space<vmem>>, vector<1x8x32xf32>
    %60 = vector.shape_cast %59 : vector<1x8x32xf32> to vector<8x32xf32>
    %cst_28 = arith.constant dense<0xFF800000> : vector<8xf32>
    %61 = vector.multi_reduction <maximumf>, %60, %cst_28 [1] : vector<8x32xf32> to vector<8xf32>
    %62 = vector.shape_cast %61 : vector<8xf32> to vector<8x1xf32>
    %63 = vector.broadcast %62 : vector<8x1xf32> to vector<8x32xf32>
    %64 = arith.subf %60, %63 : vector<8x32xf32>
    %65 = math.exp %64 : vector<8x32xf32>
    %cst_29 = arith.constant dense<0.000000e+00> : vector<8xf32>
    %66 = vector.multi_reduction <add>, %65, %cst_29 [1] : vector<8x32xf32> to vector<8xf32>
    %67 = vector.shape_cast %66 : vector<8xf32> to vector<8x1xf32>
    %cst_30 = arith.constant 0.000000e+00 : f32
    %68 = vector.broadcast %cst_30 : f32 to vector<8x32xf32>
    %69 = arith.select %3, %64, %68 : vector<8x32xi1>, vector<8x32xf32>
    %cst_31 = arith.constant dense<0.000000e+00> : vector<8xf32>
    %70 = vector.multi_reduction <add>, %69, %cst_31 [1] : vector<8x32xf32> to vector<8xf32>
    %71 = vector.shape_cast %70 : vector<8xf32> to vector<8x1xf32>
    %c0_32 = arith.constant 0 : index
    %c3_33 = arith.constant 3 : index
    %72 = vector.load %arg2[%c0_32, %c3_33] : memref<8x4xf32, #tpu.memory_space<vmem>>, vector<8x1xf32>
    %73 = math.exp %71 : vector<8x1xf32>
    %74 = arith.divf %73, %67 : vector<8x1xf32>
    %75 = arith.mulf %74, %72 : vector<8x1xf32>
    %76 = arith.addf %58, %75 : vector<8x1xf32>
    %77 = math.log %76 : vector<8x1xf32>
    %c8_i32 = arith.constant 8 : i32
    %78 = arith.muli %arg0, %c8_i32 : i32
    %79 = tpu.iota {dimensions = array<i32: 0>} : vector<8x1xi32>
    %80 = vector.broadcast %78 : i32 to vector<8x1xi32>
    %81 = arith.addi %80, %79 : vector<8x1xi32>
    %c32_i32 = arith.constant 32 : i32
    %82 = vector.broadcast %c32_i32 : i32 to vector<8x1xi32>
    %83 = arith.cmpi slt, %81, %82 : vector<8x1xi32>
    %cst_34 = arith.constant 0.000000e+00 : f32
    %84 = vector.broadcast %cst_34 : f32 to vector<8x1xf32>
    %85 = arith.select %83, %77, %84 : vector<8x1xi1>, vector<8x1xf32>
    %c0_35 = arith.constant 0 : index
    %c0_36 = arith.constant 0 : index
    %86 = vector.load %arg4[%c0_35, %c0_36] : memref<8x1xf32, #tpu.memory_space<vmem>>, vector<8x1xf32>
    tpu.vector_store %arg4[%c0_35, %c0_36], %85 {strides = array<i32>} : memref<8x1xf32, #tpu.memory_space<vmem>>, vector<8x1xf32>,
    return
  }
  func.func @transform_0(%arg0: i32) -> (i32, i32, i32) {
    %c0_i32 = arith.constant 0 : i32
    %c0_i32_0 = arith.constant 0 : i32
    %c0_i32_1 = arith.constant 0 : i32
    return %c0_i32, %arg0, %c0_i32_0 : i32, i32, i32
  }
  func.func @transform_1(%arg0: i32) -> (i32, i32) {
    %c0_i32 = arith.constant 0 : i32
    %c0_i32_0 = arith.constant 0 : i32
    return %arg0, %c0_i32 : i32, i32
  }
  func.func @transform_2(%arg0: i32) -> (i32, i32) {
    %c0_i32 = arith.constant 0 : i32
    %c0_i32_0 = arith.constant 0 : i32
    return %arg0, %c0_i32 : i32, i32
  }
  func.func @transform_3(%arg0: i32) -> (i32, i32) {
    %c0_i32 = arith.constant 0 : i32
    %c0_i32_0 = arith.constant 0 : i32
    return %arg0, %c0_i32 : i32, i32
  }
}

</mosaic_0001>

<bundles_post_ra>
// kernel: tpu_custom_call.1
= control target key start
LH: loop header
LB: loop body
LE: loop exit
PB: predicated region body
PF: predicated region fallthrough
CT: control target
= control target key end

     0   :  { %8 = vsyncpa [#allocation3], 0  ;;  %s785_s0 = inlined_call_operand.hbm [shape: f32[4,32,32], index: 0, kind: input, shape index: {}]   ;;  %s786_s1 = inlined_call_operand.vmem [shape: f32[32,4], index: 1, kind: input, shape index: {}]   ;;  %s787_s2 = inlined_call_operand.vmem [shape: s32[32,1], index: 2, kind: input, shape index: {}]   ;;  %s788_s3 = inlined_call_operand.vmem [shape: f32[32,1], index: 3, kind: output, shape index: {}]  }
   0x1   :  { %10 = vsyncpa [#allocation3 + $0x1], 0  ;;  %s663_s12 = smov 0   ;;  %s665_s13 = smov 0  }
   0x2   :  { %s667_s14 = smov 0   ;;  %s669_s15 = smov 0  }
   0x3 LB: > { %s682_s16 = sadd.s32 4294967295, %s634_s15   ;;  %s685_s17 = sadd.s32 1, %s634_s15   ;;  %s634_s15 = sphi %s669_s15, %s797_s15   ;;  %s630_s14 = sphi %s667_s14, %s796_s14   ;;  %s626_s13 = sphi %s665_s13, %s795_s13   ;;  %s622_s12 = sphi %s663_s12, %s794_s12  }
   0x4   : > { %s20_s18 = ssub.s32 %s634_s15, %s685_s17  ;;  %s23_s19 = sadd.s32 1, %s630_s14 }
   0x5   : > { %p21_p0 = scmp.eq.s32.totalorder %s20_s18, 0  ;;  %p30_p1 = scmp.ne.s32.totalorder %s630_s14, %s626_s13 }
   0x6   : > { %p31_p2 = scmp.eq.s32.totalorder %s634_s15, 0  ;;  %p36_p3 = scmp.ne.s32.totalorder %s626_s13, %s622_s12 }
   0x7   : > { %s695_s20 = scalar_select %p21_p0, %s630_s14, %s23_s19  }
   0x8   : > { %p697_p4 = por %p31_p2, %p30_p1  ;;  %p37_p5 = scmp.eq.s32.totalorder %s682_s16, 0 }
   0x9   : > { %p502_p6 = scmp.lt.s32.totalorder %s634_s15, 4  ;;  %s138_s23 = sand.u32 1, %s630_s14  }
   0xa   : > { %p703_p7 = por %p37_p5, %p36_p3  ;;  %s483_s24 = sshll.u32 %s138_s23, 5 }
   0xb   : > { %s484_s25 = sshll.u32 %s634_s15, 3  ;;  %s142_s29 = scalar_lea.vmem [#allocation2], %s483_s24 }
   0xc   : > { %s146_s28 = scalar_lea.hbm %s785_s0, %s484_s25  ;;  %s149_s30 = sshll.u32 %s142_s29, 4  ;;  %s150_s30 = int_to_ptr.vmem [resolvable:$true] %s149_s30 }
   0xd   : > { %s147_s4 = sshll.u32 %s146_s28, 4  ;;  %p714_p8 = pnand %p502_p6, %p697_p4  ;;  %s148_s4 = int_to_ptr.hbm [resolvable:$true] %s147_s4 }
   0xe   : > { %s139_s6 = scalar_lea.sflag [#allocation3], %s138_s23  ;;  %s570_s7 = sshra.s32 %s148_s4, 4  ;;  %s571_s7 = int_to_ptr.hbm [resolvable:$true] %s570_s7 }
   0xf   : > { %s572_s8 = scalar_lea.hbm %s571_s7, 32  ;;  %p574_p10 = pneg %p714_p8 }
  0x10   : > { %p573_p9 = scmp.ne.s32.totalorder %s571_s7, %s572_s8  ;;  %s577_s11 = scalar_lea.hbm %s785_s0, 128 }
  0x11   : > { %p578_p13 = scmp.lt.s32.totalorder %s571_s7, %s785_s0  ;;  %p579_p0 = scmp.lt.s32.totalorder %s577_s11, %s572_s8 }
  0x12   : > { %p575_p11 = pnand %p574_p10, %p573_p9 }
  0x13   : > { %p580_p1 = por %p579_p0, %p578_p13 }
  0x14   : > { %p576_p12 = pneg %p575_p11 }
  0x16   : > { %p581_p2 = pnand %p580_p1, %p576_p12 }
  0x18   : > { %584 = shalt.err (!%p581_p2)
}
  0x19   : > { %s636_s19 = smov 512   ;;  %s637_s21 = smov 128  }
  0x1a   : > { %s638_s23 = smov 8   ;;  %p485_p3 = scmp.ge.s32.totalorder %s634_s15, 1 }
  0x1b   : > { %501 = dma.hbm_to_vmem [thread:$0]  (!%p714_p8), %s148_s4, 512, %s150_s30, %s139_s6, %s636_s19, %s637_s21, %s638_s23  }
  0x1c   : > { %p171_p4 = scmp.lt.s32.totalorder %s634_s15, 5 }
  0x1e   : > { %p172_p5 = pnand %p485_p3, %p171_p4 }
  0x1f   : > { %s177_s24 = sand.u32 (!%p172_p5), 1, %s626_s13  }
  0x20   : > { %175 = sbr.rel (%p172_p5) target bundleno = 450 (0x1c2), region = 32  ;;  %s486_s25 = sshll.u32 (!%p172_p5), %s177_s24, 5 }
  0x21   : > { %s178_s26 = scalar_lea.sflag (!%p172_p5), [#allocation3], %s177_s24  ;;  %s181_s27 = scalar_lea.vmem (!%p172_p5), [#allocation2], %s486_s25 }
  0x25   : > { %617 = dma.done.wait (%p703_p7), %s178_s26, 512  }
  0x26   : > { %619 = vsyncadd (%p703_p7), %s178_s26, 4294966784  ;;  %v639_v0 = vmov 0   ;;  %vm232_vm0 = vcmask 261120   ;;  %v492_v1 = vld [vmem:[%s181_s27 + $0x18] sm:$0xff]  ;;  %v490_v2 = vld [vmem:[%s181_s27 + $0x8] sm:$0xff]  ;;  %p212_p6 = scmp.lt.s32.totalorder %s682_s16, 3  ;;  %v225_v24 = vlaneseq }
  0x27   : > { %542 = vset.pattern.permute.xlu1 %v639_v0  ;;  %543 = vset.pattern.permute.xlu0 %v639_v0  ;;  %v344_v3 = vsel %vm232_vm0, %v492_v1, -inf  ;;  %v268_v4 = vsel %vm232_vm0, %v490_v2, -inf  ;;  %v231_v5 = vld [vmem:[%s181_s27] sm:$0xff]  ;;  %v491_v7 = vld [vmem:[%s181_s27 + $0x10] sm:$0xff]  ;;  %s640_s7 = smov 126   ;;  %s641_s8 = smov 127  }
  0x28   : > { %345 = vmax.xlane.f32.xlu1 %v344_v3  ;;  %269 = vmax.xlane.f32.xlu0 %v268_v4  ;;  %v233_v6 = vsel %vm232_vm0, %v231_v5, -inf  ;;  %v306_v8 = vsel %vm232_vm0, %v491_v7, -inf  ;;  %s213_s15 = scalar_select %p212_p6, %s682_s16, 3  ;;  %v226_v29 = vand.u32 127, %v225_v24 }
  0x29   : > { %234 = vmax.xlane.f32.xlu2 %v233_v6  ;;  %s642_s9 = smov 125   ;;  %s493_s10 = sshll.u32 %s682_s16, 3 }
  0x2a   : > { %s741_s22 = sshll.u32 %s213_s15, 3 }
  0x2b   : > { %s219_s30 = scalar_lea.vmem %s787_s2, %s741_s22  ;;  %s215_s6 = scalar_lea.vmem %s786_s1, %s741_s22 }
  0x2c   : > { %v224_v9 = vld [vmem:[%s219_s30] sm:$0xff]  ;;  %s223_s18 = scalar_lea.vmem %s788_s3, %s741_s22 }
  0x30   : > { %307 = vmax.xlane.f32.xlu0 %v306_v8 }
  0x41   : > { %228 = vperm.xlu1 %542, %v224_v9  }
  0x9b   : > { %v270_v10 = vpop.xlane.xlu0 %269  ;;  %v346_v11 = vpop.xlane.xlu1 %345 }
  0x9c   : > { %v271_v12 = vsub.f32 %v490_v2, %v270_v10  ;;  %v347_v14 = vsub.f32 %v492_v1, %v346_v11  ;;  %v235_v21 = vpop.xlane.xlu2 %234 }
  0x9d   : > { %v236_v23 = vsub.f32 %v231_v5, %v235_v21 }
  0x9e   : > { %v272_v13 = vmul.f32 1.442695, %v271_v12  ;;  %v348_v15 = vmul.f32 1.442695, %v347_v14 }
  0x9f   : > { %v237_v28 = vmul.f32 1.442695, %v236_v23 }
  0xa0   : > { %544 = vpow2.f32 %v272_v13 }
  0xa1   : > { %546 = vpow2.f32 %v348_v15 }
  0xa3   : > { %v308_v16 = vpop.xlane.xlu0 %307 }
  0xa4   : > { %v309_v17 = vsub.f32 %v491_v7, %v308_v16 }
  0xa6   : > { %v545_v18 = vpop.eup %544  ;;  %v310_v19 = vmul.f32 1.442695, %v309_v17 }
  0xa7   : > { %v274_v20 = vsel %vm232_vm0, %v545_v18, 0.0  ;;  %v547_v22 = vpop.eup %546 }
  0xa8   : > { %548 = vpow2.f32 %v310_v19  ;;  %275 = vadd.xlane.f32.xlu2 %v274_v20  ;;  %v350_v27 = vsel %vm232_vm0, %v547_v22, 0.0 }
  0xa9   : > { %550 = vpow2.f32 %v237_v28 }
  0xae   : > { %v549_v25 = vpop.eup %548 }
  0xaf   : > { %v312_v26 = vsel %vm232_vm0, %v549_v25, 0.0  ;;  %v551_v37 = vpop.eup %550 }
  0xb0   : > { %313 = vadd.xlane.f32.xlu0 %v312_v26  ;;  %351 = vadd.xlane.f32.xlu2 %v350_v27  ;;  %v239_v39 = vsel %vm232_vm0, %v551_v37, 0.0 }
  0xb3   : > { %v229_v30 = vpop.permute.xlu1 %228 }
  0xb4   : > { %vm230_vm1 = vcmp.eq.s32.totalorder %v226_v29, %v229_v30 }
  0xb5   : > { %v315_v31 = vsel %vm230_vm1, %v309_v17, 0.0  ;;  %v277_v32 = vsel %vm230_vm1, %v271_v12, 0.0  ;;  %v242_v33 = vsel %vm230_vm1, %v236_v23, 0.0  ;;  %v353_v38 = vsel %vm230_vm1, %v347_v14, 0.0  ;;  %v246_v12 = vld [vmem:[%s215_s6] sm:$0xff] }
  0xb6   : > { %v316_v34 = vsel %vm232_vm0, %v315_v31, 0.0  ;;  %v278_v35 = vsel %vm232_vm0, %v277_v32, 0.0  ;;  %v243_v36 = vsel %vm232_vm0, %v242_v33, 0.0  ;;  %v354_v40 = vsel %vm232_vm0, %v353_v38, 0.0 }
  0xb7   : > { %244 = vadd.xlane.f32.xlu1 %v243_v36 }
  0xb8   : > { %317 = vadd.xlane.f32.xlu2 %v316_v34  ;;  %279 = vadd.xlane.f32.xlu0 %v278_v35 }
  0xc0   : > { %240 = vadd.xlane.f32.xlu2 %v239_v39  ;;  %355 = vadd.xlane.f32.xlu0 %v354_v40 }
 0x11b   : > { %v276_v41 = vpop.xlane.xlu2 %275 }
 0x11c   : > { %552 = vrcp.f32 %v276_v41  ;;  %v294_v56 = vand.u32 2147483648, %v276_v41  ;;  %vm288_vm4 = vweird.f32 %v276_v41  ;;  %v292_v62 = vand.u32 2147483647, %v276_v41 }
 0x11e   : > { %v295_v4 = vor.u32 1.1754944e-38, %v294_v56  ;;  %vm293_vm8 = vcmp.eq.f32.partialorder %v292_v62, 8.507059e+37 }
 0x122   : > { %v553_v42 = vpop.eup %552 }
 0x123   : > { %v284_v43 = vmul.f32 %v553_v42, %v276_v41  ;;  %v314_v44 = vpop.xlane.xlu0 %313  ;;  %v352_v45 = vpop.xlane.xlu2 %351  ;;  %vm289_vm2 = vweird.f32 %v553_v42 }
 0x124   : > { %554 = vrcp.f32 %v314_v44  ;;  %v332_v61 = vand.u32 2147483648, %v314_v44  ;;  %v330_v63 = vand.u32 2147483647, %v314_v44  ;;  %vm756_vm5 = vmor %vm288_vm4, %vm289_vm2  ;;  %vm326_vm6 = vweird.f32 %v314_v44 }
 0x125   : > { %556 = vrcp.f32 %v352_v45  ;;  %v285_v46 = vsub.f32 1.0, %v284_v43  ;;  %v370_v15 = vand.u32 2147483648, %v352_v45  ;;  %vm364_vm11 = vweird.f32 %v352_v45 }
 0x126   : > { %v333_v5 = vor.u32 1.1754944e-38, %v332_v61  ;;  %vm331_vm9 = vcmp.eq.f32.partialorder %v330_v63, 8.507059e+37  ;;  %v368_v18 = vand.u32 2147483647, %v352_v45 }
 0x127   : > { %v286_v48 = vmul.f32 %v553_v42, %v285_v46  ;;  %v371_v22 = vor.u32 1.1754944e-38, %v370_v15 }
 0x128   : > { %vm369_vm13 = vcmp.eq.f32.partialorder %v368_v18, 8.507059e+37 }
 0x129   : > { %v287_v58 = vadd.f32 %v553_v42, %v286_v48 }
 0x12a   : > { %v555_v47 = vpop.eup %554  ;;  %v245_v32 = vpop.xlane.xlu1 %244 }
 0x12b   : > { %v557_v49 = vpop.eup %556  ;;  %v322_v50 = vmul.f32 %v555_v47, %v314_v44  ;;  %v318_v51 = vpop.xlane.xlu2 %317  ;;  %vm327_vm3 = vweird.f32 %v555_v47  ;;  %v291_v3 = vsel %vm756_vm5, %v553_v42, %v287_v58  ;;  %v247_v34 = vmul.f32 1.442695, %v245_v32 }
 0x12c   : > { %v280_v52 = vpop.xlane.xlu0 %279  ;;  %v360_v53 = vmul.f32 %v557_v49, %v352_v45  ;;  %v319_v54 = vmul.f32 1.442695, %v318_v51  ;;  %vm328_vm7 = vmor %vm326_vm6, %vm327_vm3  ;;  %vm365_vm10 = vweird.f32 %v557_v49  ;;  %v296_v14 = vsel %vm293_vm8, %v295_v4, %v291_v3 }
 0x12d   : > { %v281_v55 = vmul.f32 1.442695, %v280_v52  ;;  %v323_v57 = vsub.f32 1.0, %v322_v50  ;;  %vm366_vm12 = vmor %vm364_vm11, %vm365_vm10  ;;  %v385_v51 = vstv %s493_s10  ;;  %vm389_vm3 = vcmask 7168  }
 0x12e   : > { %v361_v59 = vsub.f32 1.0, %v360_v53  ;;  %558 = vpow2.f32 %v319_v54 }
 0x12f   : > { %v324_v60 = vmul.f32 %v555_v47, %v323_v57  ;;  %560 = vpow2.f32 %v281_v55 }
 0x130   : > { %v362_v2 = vmul.f32 %v557_v49, %v361_v59 }
 0x131   : > { %v325_v1 = vadd.f32 %v555_v47, %v324_v60 }
 0x132   : > { %v363_v11 = vadd.f32 %v557_v49, %v362_v2 }
 0x133   : > { %v329_v7 = vsel %vm328_vm7, %v555_v47, %v325_v1  ;;  %v241_v28 = vpop.xlane.xlu2 %240 }
 0x134   : > { %v356_v6 = vpop.xlane.xlu0 %355  ;;  %v559_v8 = vpop.eup %558  ;;  %v334_v13 = vsel %vm331_vm9, %v333_v5, %v329_v7  ;;  %v367_v21 = vsel %vm366_vm12, %v557_v49, %v363_v11  ;;  %vm254_vm14 = vweird.f32 %v241_v28  ;;  %v260_v35 = vand.u32 2147483648, %v241_v28 }
 0x135   : > { %v357_v9 = vmul.f32 1.442695, %v356_v6  ;;  %v561_v10 = vpop.eup %560  ;;  %v335_v16 = vmul.f32 %v559_v8, %v334_v13  ;;  %v372_v25 = vsel %vm369_vm13, %v371_v22, %v367_v21  ;;  %v258_v37 = vand.u32 2147483647, %v241_v28 }
 0x136   : > { %v297_v17 = vmul.f32 %v561_v10, %v296_v14  ;;  %v261_v38 = vor.u32 1.1754944e-38, %v260_v35  ;;  %v384_v49 = vshrl.u32 %v225_v24, 7 }
 0x137   : > { %562 = vpow2.f32 %v357_v9  ;;  %v336_v19 = vmul.f32 %v335_v16, %v246_v12  ;;  %vm259_vm1 = vcmp.eq.f32.partialorder %v258_v37, 8.507059e+37 }
 0x138   : > { %v298_v20 = vmul.f32 %v297_v17, %v246_v12  ;;  %564 = vrcp.f32 %v241_v28  ;;  %v386_v52 = vadd.s32 %v385_v51, %v384_v49 }
 0x139   : > { %338 = vrot.lane.b32.xlu2 %v336_v19, %s640_s7  ;;  %566 = vpow2.f32 %v247_v34 }
 0x13a   : > { %300 = vrot.lane.b32.xlu0 %v298_v20, %s641_s8  ;;  %vm387_vm2 = vcmp.lt.s32.totalorder %v386_v52, 32 }
 0x13d   : > { %v563_v23 = vpop.eup %562 }
 0x13e   : > { %v373_v26 = vmul.f32 %v563_v23, %v372_v25  ;;  %v565_v29 = vpop.eup %564 }
 0x13f   : > { %v250_v30 = vmul.f32 %v565_v29, %v241_v28  ;;  %vm255_vm15 = vweird.f32 %v565_v29  ;;  %v567_v41 = vpop.eup %566 }
 0x140   : > { %v374_v27 = vmul.f32 %v373_v26, %v246_v12  ;;  %vm256_vm0 = vmor %vm254_vm14, %vm255_vm15 }
 0x141   : > { %v251_v31 = vsub.f32 1.0, %v250_v30 }
 0x142   : > { %376 = vrot.lane.b32.xlu0 %v374_v27, %s642_s9 }
 0x143   : > { %v252_v33 = vmul.f32 %v565_v29, %v251_v31 }
 0x145   : > { %v253_v36 = vadd.f32 %v565_v29, %v252_v33 }
 0x147   : > { %v257_v39 = vsel %vm256_vm0, %v565_v29, %v253_v36 }
 0x148   : > { %v262_v40 = vsel %vm259_vm1, %v261_v38, %v257_v39 }
 0x149   : > { %v263_v42 = vmul.f32 %v567_v41, %v262_v40 }
 0x14b   : > { %v264_v44 = vmul.f32 %v263_v42, %v246_v12 }
 0x193   : > { %v339_v46 = vpop.permute.xlu2 %338 }
 0x1ac   : > { %v301_v43 = vpop.permute.xlu0 %300 }
 0x1ad   : > { %v303_v45 = vadd.f32 %v301_v43, %v264_v44 }
 0x1af   : > { %v341_v47 = vadd.f32 %v339_v46, %v303_v45 }
 0x1b4   : > { %v377_v48 = vpop.permute.xlu0 %376 }
 0x1b5   : > { %v379_v50 = vadd.f32 %v377_v48, %v341_v47 }
 0x1b7   : > { %568 = vlog2.f32 %v379_v50 }
 0x1bd   : > { %v569_v53 = vpop.eup %568 }
 0x1be   : > { %v381_v54 = vmul.f32 0.6931472, %v569_v53 }
 0x1c0   : > { %v388_v55 = vsel %vm387_vm2, %v381_v54, 0.0 }
 0x1c1   : > { %390 = vst.msk [vmem:[%s223_s18] sm:$0xff] %vm389_vm3, %v388_v55 }
 0x1c2 PF: > { %p13_p7 = scmp.ge.s32.totalorder %s685_s17, 6   ;;  %s794_s12 = smov %s626_s13 }
 0x1c3   : > { %s795_s13 = smov %s630_s14  ;;  %s796_s14 = smov %s695_s20 }
 0x1c4   : > { %s797_s15 = smov %s685_s17  ;;  %15 = sbr.rel (!%p13_p7) target bundleno = 3 (0x3), region = 81 }
 0x1c9   :  { %410 = vsyncpa [#allocation3], 1 }
 0x1ca   :  { %412 = vsyncpa [#allocation3 + $0x1], 1 }

</bundles_post_ra>
